<compile_context>
chip_gen: v5e
topology: v5e:2x2
jax: 0.10.0
libtpu: 0.0.40
codegen_flags: <defaults>
</compile_context>

<pallas_src>
import functools

import jax
import jax.numpy as jnp
from jax import lax
from jax.experimental import pallas as pl
from jax.experimental.pallas import tpu as pltpu

KSIZE = 3
NEG_SLOPE = 0.2


def _conv_block_kernel(x_ref, w_ref, b_ref, o_ref, xpad_ref, col_ref, *, width):
    # x_ref:    (N, Cin, H*W)            NCHW-flat input
    # w_ref:    (Cout, 9*Cin)            weights, column order (kh, kw, ci)
    # b_ref:    (Cout, 1)                bias
    # o_ref:    (N, Cout, H*W)           NCHW-flat, lane-dense output
    # xpad_ref: (N, Cin, H*W + 2*(W+1))  scratch: flat input with zero halo
    # col_ref:  (9*Cin, N*H*W)           scratch: im2col buffer
    N, Cin, HW = x_ref.shape
    Cout = o_ref.shape[1]
    W = width
    halo = W + 1

    # Fused zero-pad of the flat H*W axis (covers the h = -1 / h = H rows).
    xpad_ref[...] = jnp.zeros_like(xpad_ref)
    xpad_ref[:, :, halo:halo + HW] = x_ref[...]

    # Row-wrap masks for the dw = +-1 taps: in the flat layout a shift of +-1
    # would read the neighbouring row's last/first pixel, which must be zero.
    w_pos = lax.broadcasted_iota(jnp.int32, (1, HW), 1) % W
    not_left = w_pos != 0              # valid where w > 0     (used for dw = -1)
    not_right = w_pos != (W - 1)       # valid where w < W - 1 (used for dw = +1)

    # Build the im2col buffer: row block t*Cin:(t+1)*Cin of col holds the input
    # shifted by tap t = (dh, dw); batch n occupies lanes [n*HW, (n+1)*HW).
    for n in range(N):
        x_n = xpad_ref[n]                                  # (Cin, HW + 2*halo)
        t = 0
        for dh in (-1, 0, 1):
            for dw in (-1, 0, 1):
                start = halo + dh * W + dw                 # static lane offset
                patch = x_n[:, start:start + HW]           # (Cin, HW)
                if dw == -1:
                    patch = jnp.where(not_left, patch, 0.0)
                elif dw == 1:
                    patch = jnp.where(not_right, patch, 0.0)
                col_ref[t * Cin:(t + 1) * Cin, n * HW:(n + 1) * HW] = patch
                t += 1

    # One fused contraction over K = 9*Cin for all batch elements at once:
    # (Cout, 9*Cin) @ (9*Cin, N*HW) -> (Cout, N*HW), f32 accumulation on MXU.
    acc = jnp.dot(w_ref[...], col_ref[...], preferred_element_type=jnp.float32)
    acc = acc + b_ref[...].astype(jnp.float32)             # (Cout, 1) broadcast
    acc = jnp.where(acc >= 0, acc, NEG_SLOPE * acc)        # LeakyReLU(0.2)

    # Lane-dense stores: (Cout, HW) rows into the NCHW-flat output.
    for n in range(N):
        o_ref[n] = acc[:, n * HW:(n + 1) * HW].astype(o_ref.dtype)


def conv_block_forward(x_nchw, w_oihw, bias):
    """Conv2d(k=3, s=1, p=1) + LeakyReLU(0.2).  x_nchw: (N, Cin, H, W)."""
    N, Cin, H, W = x_nchw.shape
    Cout = w_oihw.shape[0]
    HW = H * W
    halo = W + 1

    # NCHW-flat view: pure reshape, no transpose / pad HBM round trips.
    x_flat = x_nchw.reshape(N, Cin, HW)
    # (Cout, Cin, 3, 3) -> (Cout, (kh, kw, ci)) to match im2col row order.
    # Tiny (Cout*Cin*9 elements) — negligible wrapper work.
    w2d = jnp.transpose(w_oihw, (0, 2, 3, 1)).reshape(Cout, KSIZE * KSIZE * Cin)
    b2d = bias.reshape(Cout, 1)

    kernel = functools.partial(_conv_block_kernel, width=W)

    out_flat = pl.pallas_call(
        kernel,
        out_shape=jax.ShapeDtypeStruct((N, Cout, HW), x_nchw.dtype),
        grid_spec=pltpu.PrefetchScalarGridSpec(
            num_scalar_prefetch=0,
            grid=(1,),  # collapsed grid: whole (tiny) problem in one step
            in_specs=[
                pl.BlockSpec((N, Cin, HW), lambda i: (0, 0, 0)),
                pl.BlockSpec((Cout, KSIZE * KSIZE * Cin), lambda i: (0, 0)),
                pl.BlockSpec((Cout, 1), lambda i: (0, 0)),
            ],
            out_specs=pl.BlockSpec((N, Cout, HW), lambda i: (0, 0, 0)),
            scratch_shapes=[
                pltpu.VMEM((N, Cin, HW + 2 * halo), x_nchw.dtype),     # padded x
                pltpu.VMEM((KSIZE * KSIZE * Cin, N * HW), x_nchw.dtype),  # im2col
            ],
        ),
        compiler_params=pltpu.CompilerParams(
            dimension_semantics=("arbitrary",),
        ),
    )(x_flat, w2d, b2d)

    # (N, Cout, H*W) is already NCHW-flat; this reshape is free.
    return out_flat.reshape(N, Cout, H, W)


def _reference(x_nchw, w_oihw, bias):
    out = lax.conv_general_dilated(
        x_nchw, w_oihw,
        window_strides=(1, 1),
        padding=((1, 1), (1, 1)),
        dimension_numbers=("NCHW", "OIHW", "NCHW"),
    )
    out = out + bias.reshape(1, -1, 1, 1)
    return jnp.where(out >= 0, out, NEG_SLOPE * out)


if __name__ == "__main__":
    # conv_block(dim=2, in_channels=4, out_channels=8, stride=1)
    N, Cin, Cout, H, W = 2, 4, 8, 16, 16

    key = jax.random.PRNGKey(0)
    kx, kw, kb = jax.random.split(key, 3)
    x = jax.random.normal(kx, (N, Cin, H, W), dtype=jnp.float32)
    # Deterministic init mimicking PyTorch's uniform(-bound, bound), bound = 1/sqrt(fan_in).
    fan_in = Cin * KSIZE * KSIZE
    bound = 1.0 / (fan_in ** 0.5)
    w = jax.random.uniform(kw, (Cout, Cin, KSIZE, KSIZE), jnp.float32, -bound, bound)
    b = jax.random.uniform(kb, (Cout,), jnp.float32, -bound, bound)

    out = conv_block_forward(x, w, b)
    jax.block_until_ready(out)

    ref = _reference(x, w, b)
    assert out.shape == (N, Cout, H, W)
    assert jnp.allclose(out, ref, atol=1e-4, rtol=1e-4), "mismatch vs reference conv"

    print("KERNEL_OK")
</pallas_src>

<mosaic_0001>
module attributes {stable_mosaic.version = 11 : i64} {
  func.func @_conv_block_kernel(%arg0: i32, %arg1: memref<2x4x256xf32, #tpu.memory_space<vmem>>, %arg2: memref<8x36xf32, #tpu.memory_space<vmem>>, %arg3: memref<8x1xf32, #tpu.memory_space<vmem>>, %arg4: memref<2x8x256xf32, #tpu.memory_space<vmem>>, %arg5: memref<2x4x290xf32, #tpu.memory_space<vmem>>, %arg6: memref<36x512xf32, #tpu.memory_space<vmem>>) attributes {dimension_semantics = [#tpu.dimension_semantics<arbitrary>], iteration_bounds = array<i64: 1>, scalar_prefetch = 0 : i64, scratch_operands = 2 : i64, tpu.core_type = #tpu.core_type<tc>, window_params = [{pipeline_mode = #tpu.pipeline_mode<synchronous>, transform_indices = @transform_0, window_bounds = array<i64: 2, 4, 256>}, {pipeline_mode = #tpu.pipeline_mode<synchronous>, transform_indices = @transform_1, window_bounds = array<i64: 8, 36>}, {pipeline_mode = #tpu.pipeline_mode<synchronous>, transform_indices = @transform_2, window_bounds = array<i64: 8, 1>}, {pipeline_mode = #tpu.pipeline_mode<synchronous>, transform_indices = @transform_3, window_bounds = array<i64: 2, 8, 256>}]} {
    %cst = arith.constant 0.000000e+00 : f32
    %0 = vector.broadcast %cst : f32 to vector<2x4x290xf32>
    %c0 = arith.constant 0 : index
    %c0_0 = arith.constant 0 : index
    %c0_1 = arith.constant 0 : index
    %1 = vector.load %arg5[%c0, %c0_0, %c0_1] : memref<2x4x290xf32, #tpu.memory_space<vmem>>, vector<2x4x290xf32>
    tpu.vector_store %arg5[%c0, %c0_0, %c0_1], %0 {strides = array<i32>} : memref<2x4x290xf32, #tpu.memory_space<vmem>>, vector<2x4x290xf32>,
    %c0_2 = arith.constant 0 : index
    %c0_3 = arith.constant 0 : index
    %c0_4 = arith.constant 0 : index
    %2 = vector.load %arg1[%c0_2, %c0_3, %c0_4] : memref<2x4x256xf32, #tpu.memory_space<vmem>>, vector<2x4x256xf32>
    %c0_5 = arith.constant 0 : index
    %c0_6 = arith.constant 0 : index
    %c17 = arith.constant 17 : index
    %3 = vector.load %arg5[%c0_5, %c0_6, %c17] : memref<2x4x290xf32, #tpu.memory_space<vmem>>, vector<2x4x256xf32>
    tpu.vector_store %arg5[%c0_5, %c0_6, %c17], %2 {strides = array<i32>} : memref<2x4x290xf32, #tpu.memory_space<vmem>>, vector<2x4x256xf32>,
    %4 = tpu.iota {dimensions = array<i32: 1>} : vector<1x256xi32>
    %c16_i32 = arith.constant 16 : i32
    %c0_i32 = arith.constant 0 : i32
    %5 = arith.cmpi eq, %c16_i32, %c0_i32 : i32
    %c1_i32 = arith.constant 1 : i32
    %6 = arith.select %5, %c1_i32, %c16_i32 : i32
    %7 = vector.broadcast %6 : i32 to vector<1x256xi32>
    %8 = arith.remsi %4, %7 : vector<1x256xi32>
    %c0_i32_7 = arith.constant 0 : i32
    %9 = vector.broadcast %c0_i32_7 : i32 to vector<1x256xi32>
    %10 = arith.cmpi ne, %8, %9 : vector<1x256xi32>
    %c0_i32_8 = arith.constant 0 : i32
    %11 = vector.broadcast %c0_i32_8 : i32 to vector<1x256xi32>
    %12 = arith.cmpi slt, %8, %11 : vector<1x256xi32>
    %c0_i32_9 = arith.constant 0 : i32
    %13 = arith.cmpi slt, %6, %c0_i32_9 : i32
    %14 = vector.broadcast %13 : i1 to vector<1x256xi1>
    %15 = vector.broadcast %14 : vector<1x256xi1> to vector<1x256xi1>
    %16 = arith.xori %12, %15 : vector<1x256xi1>
    %17 = arith.andi %16, %10 : vector<1x256xi1>
    %18 = vector.broadcast %6 : i32 to vector<1x256xi32>
    %19 = arith.addi %8, %18 : vector<1x256xi32>
    %20 = arith.select %17, %19, %8 : vector<1x256xi1>, vector<1x256xi32>
    %c0_i32_10 = arith.constant 0 : i32
    %21 = vector.broadcast %c0_i32_10 : i32 to vector<1x256xi32>
    %22 = arith.cmpi ne, %20, %21 : vector<1x256xi32>
    %c15_i32 = arith.constant 15 : i32
    %23 = vector.broadcast %c15_i32 : i32 to vector<1x256xi32>
    %24 = arith.cmpi ne, %20, %23 : vector<1x256xi32>
    %c0_11 = arith.constant 0 : index
    %c0_12 = arith.constant 0 : index
    %c0_13 = arith.constant 0 : index
    %25 = vector.load %arg5[%c0_11, %c0_12, %c0_13] : memref<2x4x290xf32, #tpu.memory_space<vmem>>, vector<1x4x290xf32>
    %26 = vector.shape_cast %25 : vector<1x4x290xf32> to vector<4x290xf32>
    %27 = vector.extract_strided_slice %26 {offsets = [0, 0], sizes = [4, 256], strides = [1, 1]} : vector<4x290xf32> to vector<4x256xf32>
    %cst_14 = arith.constant 0.000000e+00 : f32
    %28 = vector.shape_cast %22 : vector<1x256xi1> to vector<1x256xi1>
    %29 = vector.broadcast %28 : vector<1x256xi1> to vector<4x256xi1>
    %30 = vector.broadcast %cst_14 : f32 to vector<4x256xf32>
    %31 = arith.select %29, %27, %30 : vector<4x256xi1>, vector<4x256xf32>
    %c0_15 = arith.constant 0 : index
    %c0_16 = arith.constant 0 : index
    %32 = vector.load %arg6[%c0_15, %c0_16] : memref<36x512xf32, #tpu.memory_space<vmem>>, vector<4x256xf32>
    tpu.vector_store %arg6[%c0_15, %c0_16], %31 {strides = array<i32>} : memref<36x512xf32, #tpu.memory_space<vmem>>, vector<4x256xf32>,
    %33 = vector.extract_strided_slice %26 {offsets = [0, 1], sizes = [4, 256], strides = [1, 1]} : vector<4x290xf32> to vector<4x256xf32>
    %c4 = arith.constant 4 : index
    %c0_17 = arith.constant 0 : index
    %34 = vector.load %arg6[%c4, %c0_17] : memref<36x512xf32, #tpu.memory_space<vmem>>, vector<4x256xf32>
    tpu.vector_store %arg6[%c4, %c0_17], %33 {strides = array<i32>} : memref<36x512xf32, #tpu.memory_space<vmem>>, vector<4x256xf32>,
    %35 = vector.extract_strided_slice %26 {offsets = [0, 2], sizes = [4, 256], strides = [1, 1]} : vector<4x290xf32> to vector<4x256xf32>
    %cst_18 = arith.constant 0.000000e+00 : f32
    %36 = vector.shape_cast %24 : vector<1x256xi1> to vector<1x256xi1>
    %37 = vector.broadcast %36 : vector<1x256xi1> to vector<4x256xi1>
    %38 = vector.broadcast %cst_18 : f32 to vector<4x256xf32>
    %39 = arith.select %37, %35, %38 : vector<4x256xi1>, vector<4x256xf32>
    %c8 = arith.constant 8 : index
    %c0_19 = arith.constant 0 : index
    %40 = vector.load %arg6[%c8, %c0_19] : memref<36x512xf32, #tpu.memory_space<vmem>>, vector<4x256xf32>
    tpu.vector_store %arg6[%c8, %c0_19], %39 {strides = array<i32>} : memref<36x512xf32, #tpu.memory_space<vmem>>, vector<4x256xf32>,
    %41 = vector.extract_strided_slice %26 {offsets = [0, 16], sizes = [4, 256], strides = [1, 1]} : vector<4x290xf32> to vector<4x256xf32>
    %cst_20 = arith.constant 0.000000e+00 : f32
    %42 = vector.shape_cast %22 : vector<1x256xi1> to vector<1x256xi1>
    %43 = vector.broadcast %42 : vector<1x256xi1> to vector<4x256xi1>
    %44 = vector.broadcast %cst_20 : f32 to vector<4x256xf32>
    %45 = arith.select %43, %41, %44 : vector<4x256xi1>, vector<4x256xf32>
    %c12 = arith.constant 12 : index
    %c0_21 = arith.constant 0 : index
    %46 = vector.load %arg6[%c12, %c0_21] : memref<36x512xf32, #tpu.memory_space<vmem>>, vector<4x256xf32>
    tpu.vector_store %arg6[%c12, %c0_21], %45 {strides = array<i32>} : memref<36x512xf32, #tpu.memory_space<vmem>>, vector<4x256xf32>,
    %47 = vector.extract_strided_slice %26 {offsets = [0, 17], sizes = [4, 256], strides = [1, 1]} : vector<4x290xf32> to vector<4x256xf32>
    %c16 = arith.constant 16 : index
    %c0_22 = arith.constant 0 : index
    %48 = vector.load %arg6[%c16, %c0_22] : memref<36x512xf32, #tpu.memory_space<vmem>>, vector<4x256xf32>
    tpu.vector_store %arg6[%c16, %c0_22], %47 {strides = array<i32>} : memref<36x512xf32, #tpu.memory_space<vmem>>, vector<4x256xf32>,
    %49 = vector.extract_strided_slice %26 {offsets = [0, 18], sizes = [4, 256], strides = [1, 1]} : vector<4x290xf32> to vector<4x256xf32>
    %cst_23 = arith.constant 0.000000e+00 : f32
    %50 = vector.shape_cast %24 : vector<1x256xi1> to vector<1x256xi1>
    %51 = vector.broadcast %50 : vector<1x256xi1> to vector<4x256xi1>
    %52 = vector.broadcast %cst_23 : f32 to vector<4x256xf32>
    %53 = arith.select %51, %49, %52 : vector<4x256xi1>, vector<4x256xf32>
    %c20 = arith.constant 20 : index
    %c0_24 = arith.constant 0 : index
    %54 = vector.load %arg6[%c20, %c0_24] : memref<36x512xf32, #tpu.memory_space<vmem>>, vector<4x256xf32>
    tpu.vector_store %arg6[%c20, %c0_24], %53 {strides = array<i32>} : memref<36x512xf32, #tpu.memory_space<vmem>>, vector<4x256xf32>,
    %55 = vector.extract_strided_slice %26 {offsets = [0, 32], sizes = [4, 256], strides = [1, 1]} : vector<4x290xf32> to vector<4x256xf32>
    %cst_25 = arith.constant 0.000000e+00 : f32
    %56 = vector.shape_cast %22 : vector<1x256xi1> to vector<1x256xi1>
    %57 = vector.broadcast %56 : vector<1x256xi1> to vector<4x256xi1>
    %58 = vector.broadcast %cst_25 : f32 to vector<4x256xf32>
    %59 = arith.select %57, %55, %58 : vector<4x256xi1>, vector<4x256xf32>
    %c24 = arith.constant 24 : index
    %c0_26 = arith.constant 0 : index
    %60 = vector.load %arg6[%c24, %c0_26] : memref<36x512xf32, #tpu.memory_space<vmem>>, vector<4x256xf32>
    tpu.vector_store %arg6[%c24, %c0_26], %59 {strides = array<i32>} : memref<36x512xf32, #tpu.memory_space<vmem>>, vector<4x256xf32>,
    %61 = vector.extract_strided_slice %26 {offsets = [0, 33], sizes = [4, 256], strides = [1, 1]} : vector<4x290xf32> to vector<4x256xf32>
    %c28 = arith.constant 28 : index
    %c0_27 = arith.constant 0 : index
    %62 = vector.load %arg6[%c28, %c0_27] : memref<36x512xf32, #tpu.memory_space<vmem>>, vector<4x256xf32>
    tpu.vector_store %arg6[%c28, %c0_27], %61 {strides = array<i32>} : memref<36x512xf32, #tpu.memory_space<vmem>>, vector<4x256xf32>,
    %63 = vector.extract_strided_slice %26 {offsets = [0, 34], sizes = [4, 256], strides = [1, 1]} : vector<4x290xf32> to vector<4x256xf32>
    %cst_28 = arith.constant 0.000000e+00 : f32
    %64 = vector.shape_cast %24 : vector<1x256xi1> to vector<1x256xi1>
    %65 = vector.broadcast %64 : vector<1x256xi1> to vector<4x256xi1>
    %66 = vector.broadcast %cst_28 : f32 to vector<4x256xf32>
    %67 = arith.select %65, %63, %66 : vector<4x256xi1>, vector<4x256xf32>
    %c32 = arith.constant 32 : index
    %c0_29 = arith.constant 0 : index
    %68 = vector.load %arg6[%c32, %c0_29] : memref<36x512xf32, #tpu.memory_space<vmem>>, vector<4x256xf32>
    tpu.vector_store %arg6[%c32, %c0_29], %67 {strides = array<i32>} : memref<36x512xf32, #tpu.memory_space<vmem>>, vector<4x256xf32>,
    %c1 = arith.constant 1 : index
    %c0_30 = arith.constant 0 : index
    %c0_31 = arith.constant 0 : index
    %69 = vector.load %arg5[%c1, %c0_30, %c0_31] : memref<2x4x290xf32, #tpu.memory_space<vmem>>, vector<1x4x290xf32>
    %70 = vector.shape_cast %69 : vector<1x4x290xf32> to vector<4x290xf32>
    %71 = vector.extract_strided_slice %70 {offsets = [0, 0], sizes = [4, 256], strides = [1, 1]} : vector<4x290xf32> to vector<4x256xf32>
    %cst_32 = arith.constant 0.000000e+00 : f32
    %72 = vector.shape_cast %22 : vector<1x256xi1> to vector<1x256xi1>
    %73 = vector.broadcast %72 : vector<1x256xi1> to vector<4x256xi1>
    %74 = vector.broadcast %cst_32 : f32 to vector<4x256xf32>
    %75 = arith.select %73, %71, %74 : vector<4x256xi1>, vector<4x256xf32>
    %c0_33 = arith.constant 0 : index
    %c256 = arith.constant 256 : index
    %76 = vector.load %arg6[%c0_33, %c256] : memref<36x512xf32, #tpu.memory_space<vmem>>, vector<4x256xf32>
    tpu.vector_store %arg6[%c0_33, %c256], %75 {strides = array<i32>} : memref<36x512xf32, #tpu.memory_space<vmem>>, vector<4x256xf32>,
    %77 = vector.extract_strided_slice %70 {offsets = [0, 1], sizes = [4, 256], strides = [1, 1]} : vector<4x290xf32> to vector<4x256xf32>
    %c4_34 = arith.constant 4 : index
    %c256_35 = arith.constant 256 : index
    %78 = vector.load %arg6[%c4_34, %c256_35] : memref<36x512xf32, #tpu.memory_space<vmem>>, vector<4x256xf32>
    tpu.vector_store %arg6[%c4_34, %c256_35], %77 {strides = array<i32>} : memref<36x512xf32, #tpu.memory_space<vmem>>, vector<4x256xf32>,
    %79 = vector.extract_strided_slice %70 {offsets = [0, 2], sizes = [4, 256], strides = [1, 1]} : vector<4x290xf32> to vector<4x256xf32>
    %cst_36 = arith.constant 0.000000e+00 : f32
    %80 = vector.shape_cast %24 : vector<1x256xi1> to vector<1x256xi1>
    %81 = vector.broadcast %80 : vector<1x256xi1> to vector<4x256xi1>
    %82 = vector.broadcast %cst_36 : f32 to vector<4x256xf32>
    %83 = arith.select %81, %79, %82 : vector<4x256xi1>, vector<4x256xf32>
    %c8_37 = arith.constant 8 : index
    %c256_38 = arith.constant 256 : index
    %84 = vector.load %arg6[%c8_37, %c256_38] : memref<36x512xf32, #tpu.memory_space<vmem>>, vector<4x256xf32>
    tpu.vector_store %arg6[%c8_37, %c256_38], %83 {strides = array<i32>} : memref<36x512xf32, #tpu.memory_space<vmem>>, vector<4x256xf32>,
    %85 = vector.extract_strided_slice %70 {offsets = [0, 16], sizes = [4, 256], strides = [1, 1]} : vector<4x290xf32> to vector<4x256xf32>
    %cst_39 = arith.constant 0.000000e+00 : f32
    %86 = vector.shape_cast %22 : vector<1x256xi1> to vector<1x256xi1>
    %87 = vector.broadcast %86 : vector<1x256xi1> to vector<4x256xi1>
    %88 = vector.broadcast %cst_39 : f32 to vector<4x256xf32>
    %89 = arith.select %87, %85, %88 : vector<4x256xi1>, vector<4x256xf32>
    %c12_40 = arith.constant 12 : index
    %c256_41 = arith.constant 256 : index
    %90 = vector.load %arg6[%c12_40, %c256_41] : memref<36x512xf32, #tpu.memory_space<vmem>>, vector<4x256xf32>
    tpu.vector_store %arg6[%c12_40, %c256_41], %89 {strides = array<i32>} : memref<36x512xf32, #tpu.memory_space<vmem>>, vector<4x256xf32>,
    %91 = vector.extract_strided_slice %70 {offsets = [0, 17], sizes = [4, 256], strides = [1, 1]} : vector<4x290xf32> to vector<4x256xf32>
    %c16_42 = arith.constant 16 : index
    %c256_43 = arith.constant 256 : index
    %92 = vector.load %arg6[%c16_42, %c256_43] : memref<36x512xf32, #tpu.memory_space<vmem>>, vector<4x256xf32>
    tpu.vector_store %arg6[%c16_42, %c256_43], %91 {strides = array<i32>} : memref<36x512xf32, #tpu.memory_space<vmem>>, vector<4x256xf32>,
    %93 = vector.extract_strided_slice %70 {offsets = [0, 18], sizes = [4, 256], strides = [1, 1]} : vector<4x290xf32> to vector<4x256xf32>
    %cst_44 = arith.constant 0.000000e+00 : f32
    %94 = vector.shape_cast %24 : vector<1x256xi1> to vector<1x256xi1>
    %95 = vector.broadcast %94 : vector<1x256xi1> to vector<4x256xi1>
    %96 = vector.broadcast %cst_44 : f32 to vector<4x256xf32>
    %97 = arith.select %95, %93, %96 : vector<4x256xi1>, vector<4x256xf32>
    %c20_45 = arith.constant 20 : index
    %c256_46 = arith.constant 256 : index
    %98 = vector.load %arg6[%c20_45, %c256_46] : memref<36x512xf32, #tpu.memory_space<vmem>>, vector<4x256xf32>
    tpu.vector_store %arg6[%c20_45, %c256_46], %97 {strides = array<i32>} : memref<36x512xf32, #tpu.memory_space<vmem>>, vector<4x256xf32>,
    %99 = vector.extract_strided_slice %70 {offsets = [0, 32], sizes = [4, 256], strides = [1, 1]} : vector<4x290xf32> to vector<4x256xf32>
    %cst_47 = arith.constant 0.000000e+00 : f32
    %100 = vector.shape_cast %22 : vector<1x256xi1> to vector<1x256xi1>
    %101 = vector.broadcast %100 : vector<1x256xi1> to vector<4x256xi1>
    %102 = vector.broadcast %cst_47 : f32 to vector<4x256xf32>
    %103 = arith.select %101, %99, %102 : vector<4x256xi1>, vector<4x256xf32>
    %c24_48 = arith.constant 24 : index
    %c256_49 = arith.constant 256 : index
    %104 = vector.load %arg6[%c24_48, %c256_49] : memref<36x512xf32, #tpu.memory_space<vmem>>, vector<4x256xf32>
    tpu.vector_store %arg6[%c24_48, %c256_49], %103 {strides = array<i32>} : memref<36x512xf32, #tpu.memory_space<vmem>>, vector<4x256xf32>,
    %105 = vector.extract_strided_slice %70 {offsets = [0, 33], sizes = [4, 256], strides = [1, 1]} : vector<4x290xf32> to vector<4x256xf32>
    %c28_50 = arith.constant 28 : index
    %c256_51 = arith.constant 256 : index
    %106 = vector.load %arg6[%c28_50, %c256_51] : memref<36x512xf32, #tpu.memory_space<vmem>>, vector<4x256xf32>
    tpu.vector_store %arg6[%c28_50, %c256_51], %105 {strides = array<i32>} : memref<36x512xf32, #tpu.memory_space<vmem>>, vector<4x256xf32>,
    %107 = vector.extract_strided_slice %70 {offsets = [0, 34], sizes = [4, 256], strides = [1, 1]} : vector<4x290xf32> to vector<4x256xf32>
    %cst_52 = arith.constant 0.000000e+00 : f32
    %108 = vector.shape_cast %24 : vector<1x256xi1> to vector<1x256xi1>
    %109 = vector.broadcast %108 : vector<1x256xi1> to vector<4x256xi1>
    %110 = vector.broadcast %cst_52 : f32 to vector<4x256xf32>
    %111 = arith.select %109, %107, %110 : vector<4x256xi1>, vector<4x256xf32>
    %c32_53 = arith.constant 32 : index
    %c256_54 = arith.constant 256 : index
    %112 = vector.load %arg6[%c32_53, %c256_54] : memref<36x512xf32, #tpu.memory_space<vmem>>, vector<4x256xf32>
    tpu.vector_store %arg6[%c32_53, %c256_54], %111 {strides = array<i32>} : memref<36x512xf32, #tpu.memory_space<vmem>>, vector<4x256xf32>,
    %c0_55 = arith.constant 0 : index
    %c0_56 = arith.constant 0 : index
    %113 = vector.load %arg2[%c0_55, %c0_56] : memref<8x36xf32, #tpu.memory_space<vmem>>, vector<8x36xf32>
    %c0_57 = arith.constant 0 : index
    %c0_58 = arith.constant 0 : index
    %114 = vector.load %arg6[%c0_57, %c0_58] : memref<36x512xf32, #tpu.memory_space<vmem>>, vector<36x512xf32>
    %cst_59 = arith.constant dense<0.000000e+00> : vector<8x512xf32>
    %115 = tpu.matmul %113, %114, %cst_59 {dimension_numbers = #tpu.dot_dimension_numbers<[1], [0], [0], [1], [0, 0, 1, 1], [], []>} : vector<8x36xf32>, vector<36x512xf32>, vector<8x512xf32> -> vector<8x512xf32>
    %c0_60 = arith.constant 0 : index
    %c0_61 = arith.constant 0 : index
    %116 = vector.load %arg3[%c0_60, %c0_61] : memref<8x1xf32, #tpu.memory_space<vmem>>, vector<8x1xf32>
    %117 = vector.broadcast %116 : vector<8x1xf32> to vector<8x512xf32>
    %118 = arith.addf %115, %117 : vector<8x512xf32>
    %cst_62 = arith.constant 0.000000e+00 : f32
    %119 = vector.broadcast %cst_62 : f32 to vector<8x512xf32>
    %120 = arith.cmpf oge, %118, %119 : vector<8x512xf32>
    %cst_63 = arith.constant 2.000000e-01 : f32
    %121 = vector.broadcast %cst_63 : f32 to vector<8x512xf32>
    %122 = arith.mulf %121, %118 : vector<8x512xf32>
    %123 = arith.select %120, %118, %122 : vector<8x512xi1>, vector<8x512xf32>
    %124 = vector.extract_strided_slice %123 {offsets = [0, 0], sizes = [8, 256], strides = [1, 1]} : vector<8x512xf32> to vector<8x256xf32>
    %c0_64 = arith.constant 0 : index
    %c0_65 = arith.constant 0 : index
    %c0_66 = arith.constant 0 : index
    %125 = vector.load %arg4[%c0_64, %c0_65, %c0_66] : memref<2x8x256xf32, #tpu.memory_space<vmem>>, vector<1x8x256xf32>
    %126 = vector.shape_cast %125 : vector<1x8x256xf32> to vector<8x256xf32>
    %127 = vector.shape_cast %124 : vector<8x256xf32> to vector<1x8x256xf32>
    tpu.vector_store %arg4[%c0_64, %c0_65, %c0_66], %127 {strides = array<i32>} : memref<2x8x256xf32, #tpu.memory_space<vmem>>, vector<1x8x256xf32>,
    %128 = vector.extract_strided_slice %123 {offsets = [0, 256], sizes = [8, 256], strides = [1, 1]} : vector<8x512xf32> to vector<8x256xf32>
    %c1_67 = arith.constant 1 : index
    %c0_68 = arith.constant 0 : index
    %c0_69 = arith.constant 0 : index
    %129 = vector.load %arg4[%c1_67, %c0_68, %c0_69] : memref<2x8x256xf32, #tpu.memory_space<vmem>>, vector<1x8x256xf32>
    %130 = vector.shape_cast %129 : vector<1x8x256xf32> to vector<8x256xf32>
    %131 = vector.shape_cast %128 : vector<8x256xf32> to vector<1x8x256xf32>
    tpu.vector_store %arg4[%c1_67, %c0_68, %c0_69], %131 {strides = array<i32>} : memref<2x8x256xf32, #tpu.memory_space<vmem>>, vector<1x8x256xf32>,
    return
  }
  func.func @transform_0(%arg0: i32) -> (i32, i32, i32) {
    %c0_i32 = arith.constant 0 : i32
    %c0_i32_0 = arith.constant 0 : i32
    %c0_i32_1 = arith.constant 0 : i32
    %c0_i32_2 = arith.constant 0 : i32
    return %c0_i32, %c0_i32_0, %c0_i32_1 : i32, i32, i32
  }
  func.func @transform_1(%arg0: i32) -> (i32, i32) {
    %c0_i32 = arith.constant 0 : i32
    %c0_i32_0 = arith.constant 0 : i32
    %c0_i32_1 = arith.constant 0 : i32
    return %c0_i32, %c0_i32_0 : i32, i32
  }
  func.func @transform_2(%arg0: i32) -> (i32, i32) {
    %c0_i32 = arith.constant 0 : i32
    %c0_i32_0 = arith.constant 0 : i32
    %c0_i32_1 = arith.constant 0 : i32
    return %c0_i32, %c0_i32_0 : i32, i32
  }
  func.func @transform_3(%arg0: i32) -> (i32, i32, i32) {
    %c0_i32 = arith.constant 0 : i32
    %c0_i32_0 = arith.constant 0 : i32
    %c0_i32_1 = arith.constant 0 : i32
    %c0_i32_2 = arith.constant 0 : i32
    return %c0_i32, %c0_i32_0, %c0_i32_1 : i32, i32, i32
  }
}

</mosaic_0001>

<bundles_post_ra>
// kernel: tpu_custom_call.1
= control target key start
LH: loop header
LB: loop body
LE: loop exit
PB: predicated region body
PF: predicated region fallthrough
CT: control target
= control target key end

     0   :  { %8 = vsyncpa [#allocation5], 0  ;;  %s998_s0 = inlined_call_operand.hbm [shape: f32[2,4,256], index: 0, kind: input, shape index: {}]   ;;  %s999_s1 = inlined_call_operand.vmem [shape: f32[8,36], index: 1, kind: input, shape index: {}]   ;;  %s1000_s2 = inlined_call_operand.vmem [shape: f32[8,1], index: 2, kind: input, shape index: {}]   ;;  %s1001_s3 = inlined_call_operand.hbm [shape: f32[2,8,256], index: 3, kind: output, shape index: {}]  }
   0x1   :  { %9 = vsyncpa [#allocation6], 0  ;;  %s14_s14 = sshll.u32 %s998_s0, 4  ;;  %s710_s15 = smov [#allocation4]   ;;  %s15_s14 = int_to_ptr.hbm [resolvable:$true] %s14_s14 }
   0x2   :  { %s16_s16 = sshll.u32 %s710_s15, 4  ;;  %s711_s17 = smov 128   ;;  %s17_s16 = int_to_ptr.vmem [resolvable:$true] %s16_s16 }
   0x3   :  { %s712_s18 = smov 8  }
   0x4   :  { %22 = dma.hbm_to_vmem [thread:$0]  %s15_s14, 256, %s17_s16, [#allocation5], %s711_s17, %s711_s17, %s712_s18  }
   0x5   :  { %706 = dma.done.wait [#allocation5], 256  }
   0x6   :  { %707 = vsyncadd [#allocation5], 4294967040  ;;  %vm32_vm0 = vcmask 273408   ;;  %v713_v0 = vmov 0.0   ;;  %v36_v1 = vld [vmem:[#allocation4] sm:$0xff]  ;;  %s714_s19 = smov 17   ;;  %v61_v6 = vlaneseq }
   0x7   :  { %31 = vst [vmem:[#allocation2] sm:$0xff] %v713_v0  ;;  %40 = vrot.lane.b32.xlu0 %v36_v1, %s714_s19  ;;  %v37_v2 = vld [vmem:[#allocation4 + $0x8] sm:$0xff]  ;;  %vm53_vm1 = vcmask 1043592   ;;  %vm54_vm2 = vcmask 1047556   ;;  %vm46_vm3 = vcmask 138240   ;;  %vm57_vm4 = vcmask 134144  }
   0x8   :  { %33 = vst.msk [vmem:[#allocation2 + $0x8] sm:$0xf] %vm32_vm0, %v713_v0  ;;  %vm750_vm5 = vmor %vm54_vm2, %vm53_vm1  ;;  %v758_v8 = vand.u32 127, %v61_v6  ;;  %s715_s0 = smov 112   ;;  %s716_s20 = smov 111   ;;  %vm166_vm8 = vcmask 916480  }
   0x9   :  { %34 = vst [vmem:[#allocation2 + $0xc] sm:$0xff] %v713_v0  ;;  %s717_s21 = smov 110   ;;  %s718_s22 = smov 96   ;;  %vm193_vm9 = vcmask 908288   ;;  %vm212_vm10 = vcmask 900096   ;;  %vm239_vm13 = vcmask 785408  }
   0xa   :  { %35 = vst.msk [vmem:[#allocation2 + $0x14] sm:$0xf] %vm32_vm0, %v713_v0  ;;  %v761_v9 = vadd.s32 128, %v758_v8  ;;  %v68_v12 = vand.u32 15, %v758_v8  ;;  %s719_s23 = smov 95   ;;  %s720_s24 = smov 94  }
   0xb   :  { %s721_s25 = smov 127   ;;  %s722_s26 = smov 126   ;;  %vm261_vm14 = vcmask 777216   ;;  %vm280_vm15 = vcmask 769024   ;;  %vm502_vm0 = vcmask 1043456   ;;  %vm122_vm1 = vcmask 1039360  }
   0xc   :  { %v75_v13 = vand.u32 15, %v761_v9  ;;  %vm773_vm6 = vcmp.ne.s32.totalorder %v68_v12, 0  ;;  %vm905_vm11 = vcmp.ne.s32.totalorder %v68_v12, 15  ;;  %vm145_vm2 = vcmask 1031168   ;;  %s618_s6 = sshll.u32 %s1001_s3, 4  ;;  %s725_s7 = smov 256   ;;  %s619_s6 = int_to_ptr.hbm [resolvable:$true] %s618_s6 }
   0xd   :  { %s726_s8 = smov 16  }
   0xe   :  { %vm779_vm7 = vcmp.ne.s32.totalorder %v75_v13, 0  ;;  %vm911_vm12 = vcmp.ne.s32.totalorder %v75_v13, 15 }
   0xf   :  { %42 = vrot.lane.b32.xlu0 %v37_v2, %s714_s19 }
  0x79   :  { %v41_v3 = vpop.permute.xlu0 %40 }
  0x7a   :  { %v44_v5 = vrot.slane %v41_v3, 4 }
  0x7c   :  { %v47_v7 = vsel %vm46_vm3, %v44_v5, %v41_v3  ;;  %58 = vst.msk [vmem:[#allocation2 + $0x8] sm:$0xf] %vm57_vm4, %v44_v5 }
  0x7d   :  { %56 = vst.msk [vmem:[#allocation2] sm:$0xff] %vm750_vm5, %v47_v7 }
  0x81   :  { %v43_v24 = vpop.permute.xlu0 %42 }
  0x82   :  { %v45_v25 = vrot.slane %v43_v24, 4 }
  0x83   :  { %v763_v10 = vld [vmem:[#allocation2 + $0x8] sm:$0xf] }
  0x84   :  { %v765_v11 = vld [vmem:[#allocation2] sm:$0xff]  ;;  %112 = vst [vmem:[#allocation1 + $0x11] ss:$2 sm:$0xff] %v763_v10  ;;  %v48_v26 = vsel %vm46_vm3, %v45_v25, %v43_v24  ;;  %vm498_vm3 = vcmask 293888  }
  0x85   :  { %99 = vst [vmem:[#allocation1] ss:$2 sm:$0xff] %v765_v11 }
  0x86   :  { %60 = vst.msk [vmem:[#allocation2 + $0x14] sm:$0xf] %vm57_vm4, %v45_v25 }
  0x87   :  { %59 = vst.msk [vmem:[#allocation2 + $0xc] sm:$0xff] %vm750_vm5, %v48_v26 }
  0x8b   :  { %v783_v16 = vld.sshfl [vmem:[#allocation1 + $0x10] sm:$0xff pattern:$0x75316420] }
  0x8c   :  { %v100_v17 = vld.sshfl [vmem:[#allocation1] sm:$0xff pattern:$0x75316420]  ;;  %v101_v18 = vld.sshfl [vmem:[#allocation1 + $0x8] sm:$0xff pattern:$0x75316420] }
  0x8d   :  { %110 = vst [vmem:[#allocation1 + $0x1] ss:$2 sm:$0xff] %v765_v11  ;;  %v105_v19 = vsel %vm779_vm7, %v101_v18, 0.0  ;;  %v104_v20 = vsel %vm773_vm6, %v100_v17, 0.0  ;;  %v830_v42 = vld [vmem:[#allocation2 + $0x14] sm:$0xf] }
  0x8e   :  { %135 = vst [vmem:[#allocation1 + $0x10] ss:$2 sm:$0xff] %v763_v10  ;;  %v837_v46 = vld [vmem:[#allocation2 + $0xc] sm:$0xff] }
  0x8f   :  { %107 = vst [vmem:[#allocation3 + $0x68] sm:$0xf] %v105_v19 }
  0x90   :  { %106 = vst [vmem:[#allocation3] sm:$0xf] %v104_v20 }
  0x94   :  { %v791_v21 = vld.sshfl [vmem:[#allocation1] sm:$0xff pattern:$0x75316420]  ;;  %v793_v22 = vld.sshfl [vmem:[#allocation1 + $0x8] sm:$0xff pattern:$0x75316420] }
  0x95   :  { %133 = vst [vmem:[#allocation1] ss:$2 sm:$0xff] %v765_v11  ;;  %v796_v23 = vld.sshfl [vmem:[#allocation1 + $0x10] sm:$0xff pattern:$0x75316420] }
  0x96   :  { %156 = vst [vmem:[#allocation1 + $0x10] ss:$2 sm:$0xff] %v763_v10 }
  0x9c   :  { %v803_v27 = vld.sshfl [vmem:[#allocation1] sm:$0xff pattern:$0x75316420]  ;;  %v805_v28 = vld.sshfl [vmem:[#allocation1 + $0x8] sm:$0xff pattern:$0x75316420] }
  0x9d   :  { %154 = vst [vmem:[#allocation1] ss:$2 sm:$0xff] %v765_v11  ;;  %v159_v29 = vld.sshfl [vmem:[#allocation1 + $0x10] sm:$0xff pattern:$0x75316420] }
  0x9e   :  { %164 = vrot.lane.b32.xlu1 %v159_v29, %s715_s0  ;;  %183 = vst [vmem:[#allocation1 + $0x10] ss:$2 sm:$0xff] %v763_v10 }
  0xa4   :  { %v158_v30 = vld.sshfl [vmem:[#allocation1 + $0x8] sm:$0xff pattern:$0x75316420]  ;;  %v157_v31 = vld.sshfl [vmem:[#allocation1] sm:$0xff pattern:$0x75316420] }
  0xa5   :  { %v186_v32 = vld.sshfl [vmem:[#allocation1 + $0x10] sm:$0xff pattern:$0x75316420]  ;;  %162 = vrot.lane.b32.xlu0 %v158_v30, %s715_s0  ;;  %160 = vrot.lane.b32.xlu2 %v157_v31, %s715_s0  ;;  %181 = vst [vmem:[#allocation1] ss:$2 sm:$0xff] %v765_v11 }
  0xa6   :  { %191 = vrot.lane.b32.xlu1 %v186_v32, %s716_s20  ;;  %202 = vst [vmem:[#allocation1 + $0x10] ss:$2 sm:$0xff] %v763_v10 }
  0xac   :  { %v185_v33 = vld.sshfl [vmem:[#allocation1 + $0x8] sm:$0xff pattern:$0x75316420]  ;;  %v184_v34 = vld.sshfl [vmem:[#allocation1] sm:$0xff pattern:$0x75316420] }
  0xad   :  { %v205_v35 = vld.sshfl [vmem:[#allocation1 + $0x10] sm:$0xff pattern:$0x75316420]  ;;  %189 = vrot.lane.b32.xlu0 %v185_v33, %s716_s20  ;;  %187 = vrot.lane.b32.xlu2 %v184_v34, %s716_s20  ;;  %200 = vst [vmem:[#allocation1] ss:$2 sm:$0xff] %v765_v11 }
  0xae   :  { %210 = vrot.lane.b32.xlu1 %v205_v35, %s717_s21  ;;  %229 = vst [vmem:[#allocation1 + $0x10] ss:$2 sm:$0xff] %v763_v10 }
  0xb4   :  { %v204_v36 = vld.sshfl [vmem:[#allocation1 + $0x8] sm:$0xff pattern:$0x75316420]  ;;  %v203_v37 = vld.sshfl [vmem:[#allocation1] sm:$0xff pattern:$0x75316420] }
  0xb5   :  { %v232_v38 = vld.sshfl [vmem:[#allocation1 + $0x10] sm:$0xff pattern:$0x75316420]  ;;  %208 = vrot.lane.b32.xlu0 %v204_v36, %s717_s21  ;;  %206 = vrot.lane.b32.xlu2 %v203_v37, %s717_s21  ;;  %227 = vst [vmem:[#allocation1] ss:$2 sm:$0xff] %v765_v11 }
  0xb6   :  { %237 = vrot.lane.b32.xlu1 %v232_v38, %s718_s22  ;;  %251 = vst [vmem:[#allocation1 + $0x11] ss:$2 sm:$0xff] %v763_v10 }
  0xbc   :  { %v231_v39 = vld.sshfl [vmem:[#allocation1 + $0x8] sm:$0xff pattern:$0x75316420]  ;;  %v230_v40 = vld.sshfl [vmem:[#allocation1] sm:$0xff pattern:$0x75316420] }
  0xbd   :  { %v254_v41 = vld.sshfl [vmem:[#allocation1 + $0x10] sm:$0xff pattern:$0x75316420]  ;;  %235 = vrot.lane.b32.xlu0 %v231_v39, %s718_s22  ;;  %233 = vrot.lane.b32.xlu2 %v230_v40, %s718_s22  ;;  %249 = vst [vmem:[#allocation1 + $0x1] ss:$2 sm:$0xff] %v765_v11 }
  0xbe   :  { %259 = vrot.lane.b32.xlu1 %v254_v41, %s719_s23  ;;  %270 = vst [vmem:[#allocation1 + $0x10] ss:$2 sm:$0xff] %v763_v10 }
  0xc4   :  { %v253_v43 = vld.sshfl [vmem:[#allocation1 + $0x8] sm:$0xff pattern:$0x75316420]  ;;  %v252_v44 = vld.sshfl [vmem:[#allocation1] sm:$0xff pattern:$0x75316420] }
  0xc5   :  { %v273_v45 = vld.sshfl [vmem:[#allocation1 + $0x10] sm:$0xff pattern:$0x75316420]  ;;  %257 = vrot.lane.b32.xlu0 %v253_v43, %s719_s23  ;;  %255 = vrot.lane.b32.xlu2 %v252_v44, %s719_s23  ;;  %268 = vst [vmem:[#allocation1] ss:$2 sm:$0xff] %v765_v11 }
  0xc6   :  { %278 = vrot.lane.b32.xlu1 %v273_v45, %s720_s24  ;;  %306 = vst [vmem:[#allocation1 + $0x11] ss:$2 sm:$0xff] %v830_v42 }
  0xcc   :  { %v272_v47 = vld.sshfl [vmem:[#allocation1 + $0x8] sm:$0xff pattern:$0x75316420]  ;;  %v271_v48 = vld.sshfl [vmem:[#allocation1] sm:$0xff pattern:$0x75316420] }
  0xcd   :  { %v309_v49 = vld.sshfl [vmem:[#allocation1 + $0x10] sm:$0xff pattern:$0x75316420]  ;;  %276 = vrot.lane.b32.xlu0 %v272_v47, %s720_s24  ;;  %274 = vrot.lane.b32.xlu2 %v271_v48, %s720_s24  ;;  %293 = vst [vmem:[#allocation1] ss:$2 sm:$0xff] %v837_v46 }
  0xce   :  { %314 = vrot.lane.b32.xlu1 %v309_v49, %s721_s25  ;;  %324 = vst [vmem:[#allocation1 + $0x10] ss:$2 sm:$0xff] %v830_v42 }
  0xd4   :  { %v294_v50 = vld.sshfl [vmem:[#allocation1] sm:$0xff pattern:$0x75316420]  ;;  %v295_v51 = vld.sshfl [vmem:[#allocation1 + $0x8] sm:$0xff pattern:$0x75316420] }
  0xd5   :  { %304 = vst [vmem:[#allocation1 + $0x1] ss:$2 sm:$0xff] %v837_v46  ;;  %v327_v52 = vld.sshfl [vmem:[#allocation1 + $0x10] sm:$0xff pattern:$0x75316420]  ;;  %v298_v53 = vsel %vm773_vm6, %v294_v50, 0.0 }
  0xd6   :  { %332 = vrot.lane.b32.xlu1 %v327_v52, %s722_s26  ;;  %344 = vst [vmem:[#allocation1 + $0x10] ss:$2 sm:$0xff] %v830_v42  ;;  %v299_v54 = vsel %vm779_vm7, %v295_v51, 0.0 }
  0xd7   :  { %300 = vst [vmem:[#allocation3 + $0x48] sm:$0xf] %v298_v53 }
  0xd8   :  { %301 = vst [vmem:[#allocation3 + $0x80] sm:$0xf] %v299_v54 }
  0xdc   :  { %v308_v55 = vld.sshfl [vmem:[#allocation1 + $0x8] sm:$0xff pattern:$0x75316420]  ;;  %v307_v56 = vld.sshfl [vmem:[#allocation1] sm:$0xff pattern:$0x75316420] }
  0xdd   :  { %v347_v57 = vld.sshfl [vmem:[#allocation1 + $0x10] sm:$0xff pattern:$0x75316420]  ;;  %312 = vrot.lane.b32.xlu0 %v308_v55, %s721_s25  ;;  %310 = vrot.lane.b32.xlu2 %v307_v56, %s721_s25  ;;  %322 = vst [vmem:[#allocation1] ss:$2 sm:$0xff] %v837_v46 }
  0xde   :  { %352 = vrot.lane.b32.xlu1 %v347_v57, %s715_s0  ;;  %370 = vst [vmem:[#allocation1 + $0x10] ss:$2 sm:$0xff] %v830_v42 }
  0xe4   :  { %v326_v58 = vld.sshfl [vmem:[#allocation1 + $0x8] sm:$0xff pattern:$0x75316420]  ;;  %v325_v59 = vld.sshfl [vmem:[#allocation1] sm:$0xff pattern:$0x75316420] }
  0xe5   :  { %v373_v60 = vld.sshfl [vmem:[#allocation1 + $0x10] sm:$0xff pattern:$0x75316420]  ;;  %330 = vrot.lane.b32.xlu0 %v326_v58, %s722_s26  ;;  %328 = vrot.lane.b32.xlu2 %v325_v59, %s722_s26  ;;  %342 = vst [vmem:[#allocation1] ss:$2 sm:$0xff] %v837_v46 }
  0xe6   :  { %378 = vrot.lane.b32.xlu1 %v373_v60, %s716_s20  ;;  %388 = vst [vmem:[#allocation1 + $0x10] ss:$2 sm:$0xff] %v830_v42 }
  0xec   :  { %v346_v61 = vld.sshfl [vmem:[#allocation1 + $0x8] sm:$0xff pattern:$0x75316420]  ;;  %v345_v62 = vld.sshfl [vmem:[#allocation1] sm:$0xff pattern:$0x75316420] }
  0xed   :  { %v391_v63 = vld.sshfl [vmem:[#allocation1 + $0x10] sm:$0xff pattern:$0x75316420]  ;;  %350 = vrot.lane.b32.xlu0 %v346_v61, %s715_s0  ;;  %348 = vrot.lane.b32.xlu2 %v345_v62, %s715_s0  ;;  %368 = vst [vmem:[#allocation1] ss:$2 sm:$0xff] %v837_v46 }
  0xee   :  { %396 = vrot.lane.b32.xlu1 %v391_v63, %s717_s21  ;;  %414 = vst [vmem:[#allocation1 + $0x10] ss:$2 sm:$0xff] %v830_v42 }
  0xf4   :  { %v372_v0 = vld.sshfl [vmem:[#allocation1 + $0x8] sm:$0xff pattern:$0x75316420]  ;;  %v371_v1 = vld.sshfl [vmem:[#allocation1] sm:$0xff pattern:$0x75316420] }
  0xf5   :  { %v417_v2 = vld.sshfl [vmem:[#allocation1 + $0x10] sm:$0xff pattern:$0x75316420]  ;;  %376 = vrot.lane.b32.xlu0 %v372_v0, %s716_s20  ;;  %374 = vrot.lane.b32.xlu2 %v371_v1, %s716_s20  ;;  %386 = vst [vmem:[#allocation1] ss:$2 sm:$0xff] %v837_v46 }
  0xf6   :  { %422 = vrot.lane.b32.xlu1 %v417_v2, %s718_s22  ;;  %435 = vst [vmem:[#allocation1 + $0x11] ss:$2 sm:$0xff] %v830_v42 }
  0xfc   :  { %v390_v3 = vld.sshfl [vmem:[#allocation1 + $0x8] sm:$0xff pattern:$0x75316420]  ;;  %v389_v4 = vld.sshfl [vmem:[#allocation1] sm:$0xff pattern:$0x75316420] }
  0xfd   :  { %v438_v5 = vld.sshfl [vmem:[#allocation1 + $0x10] sm:$0xff pattern:$0x75316420]  ;;  %394 = vrot.lane.b32.xlu0 %v390_v3, %s717_s21  ;;  %392 = vrot.lane.b32.xlu2 %v389_v4, %s717_s21  ;;  %412 = vst [vmem:[#allocation1] ss:$2 sm:$0xff] %v837_v46 }
  0xfe   :  { %443 = vrot.lane.b32.xlu1 %v438_v5, %s719_s23  ;;  %453 = vst [vmem:[#allocation1 + $0x10] ss:$2 sm:$0xff] %v830_v42 }
  0xff   :  { %v161_v6 = vpop.permute.xlu2 %160 }
 0x104   :  { %v416_v7 = vld.sshfl [vmem:[#allocation1 + $0x8] sm:$0xff pattern:$0x75316420]  ;;  %v415_v10 = vld.sshfl [vmem:[#allocation1] sm:$0xff pattern:$0x75316420] }
 0x105   :  { %v456_v11 = vld.sshfl [vmem:[#allocation1 + $0x10] sm:$0xff pattern:$0x75316420]  ;;  %420 = vrot.lane.b32.xlu0 %v416_v7, %s718_s22  ;;  %433 = vst [vmem:[#allocation1 + $0x1] ss:$2 sm:$0xff] %v837_v46 }
 0x106   :  { %461 = vrot.lane.b32.xlu2 %v456_v11, %s720_s24 }
 0x107   :  { %v188_v17 = vpop.permute.xlu2 %187 }
 0x10c   :  { %v437_v18 = vld.sshfl [vmem:[#allocation1 + $0x8] sm:$0xff pattern:$0x75316420]  ;;  %v436_v19 = vld.sshfl [vmem:[#allocation1] sm:$0xff pattern:$0x75316420] }
 0x10d   :  { %441 = vrot.lane.b32.xlu0 %v437_v18, %s719_s23  ;;  %451 = vst [vmem:[#allocation1] ss:$2 sm:$0xff] %v837_v46 }
 0x10e   :  { %418 = vrot.lane.b32.xlu2 %v415_v10, %s718_s22 }
 0x10f   :  { %v207_v24 = vpop.permute.xlu2 %206 }
 0x110   :  { %v165_v20 = vpop.permute.xlu1 %164 }
 0x114   :  { %v454_v25 = vld.sshfl [vmem:[#allocation1] sm:$0xff pattern:$0x75316420]  ;;  %v455_v36 = vld.sshfl [vmem:[#allocation1 + $0x8] sm:$0xff pattern:$0x75316420] }
 0x115   :  { %141 = vrot.lane.b32.xlu0 %v805_v28, %s722_s26  ;;  %457 = vrot.lane.b32.xlu1 %v454_v25, %s720_s24 }
 0x116   :  { %439 = vrot.lane.b32.xlu2 %v436_v19, %s719_s23 }
 0x117   :  { %v163_v26 = vpop.permute.xlu0 %162  ;;  %v234_v28 = vpop.permute.xlu2 %233 }
 0x118   :  { %v192_v29 = vpop.permute.xlu1 %191  ;;  %v167_v30 = vsel %vm166_vm8, %v161_v6, %v163_v26  ;;  %v168_v31 = vsel %vm166_vm8, %v163_v26, %v165_v20 }
 0x119   :  { %v171_v32 = vsel %vm773_vm6, %v167_v30, 0.0  ;;  %v172_v33 = vsel %vm779_vm7, %v168_v31, 0.0 }
 0x11a   :  { %v175_v34 = vrot.slane %v171_v32, 4  ;;  %v176_v35 = vrot.slane %v172_v33, 4 }
 0x11c   :  { %179 = vst [vmem:[#allocation3 + $0x10] sm:$0xf0] %v175_v34 }
 0x11d   :  { %180 = vst [vmem:[#allocation3 + $0x28] sm:$0xf0] %v176_v35  ;;  %118 = vrot.lane.b32.xlu0 %v793_v22, %s721_s25  ;;  %459 = vrot.lane.b32.xlu1 %v455_v36, %s720_s24  ;;  %v471_v22 = vld [vmem:[%s999_s1] sm:$0xff]  ;;  %s724_s1 = smov [#allocation7]  }
 0x11e   :  { %139 = vrot.lane.b32.xlu2 %v803_v27, %s722_s26  ;;  %s616_s30 = sshll.u32 %s724_s1, 4  ;;  %s617_s30 = int_to_ptr.vmem [resolvable:$true] %s616_s30 }
 0x11f   :  { %v190_v37 = vpop.permute.xlu0 %189  ;;  %v256_v41 = vpop.permute.xlu2 %255 }
 0x120   :  { %v211_v38 = vpop.permute.xlu1 %210  ;;  %v194_v39 = vsel %vm193_vm9, %v188_v17, %v190_v37  ;;  %v195_v40 = vsel %vm193_vm9, %v190_v37, %v192_v29 }
 0x121   :  { %198 = vst [vmem:[#allocation3 + $0x60] sm:$0xf] %v194_v39 }
 0x122   :  { %199 = vst [vmem:[#allocation3 + $0x38] sm:$0xf] %v195_v40 }
 0x125   :  { %143 = vrot.lane.b32.xlu1 %v796_v23, %s722_s26 }
 0x126   :  { %116 = vrot.lane.b32.xlu2 %v791_v21, %s721_s25 }
 0x127   :  { %v209_v42 = vpop.permute.xlu0 %208  ;;  %v275_v9 = vpop.permute.xlu2 %274 }
 0x128   :  { %v238_v43 = vpop.permute.xlu1 %237  ;;  %v213_v23 = vsel %vm212_vm10, %v207_v24, %v209_v42  ;;  %v214_v44 = vsel %vm212_vm10, %v209_v42, %v211_v38 }
 0x129   :  { %v217_v21 = vsel %vm905_vm11, %v213_v23, 0.0  ;;  %v218_v8 = vsel %vm911_vm12, %v214_v44, 0.0 }
 0x12a   :  { %v221_v12 = vrot.slane %v217_v21, 4  ;;  %v222_v45 = vrot.slane %v218_v8, 4 }
 0x12c   :  { %225 = vst [vmem:[#allocation3 + $0x60] sm:$0xf0] %v221_v12 }
 0x12d   :  { %226 = vst [vmem:[#allocation3 + $0x38] sm:$0xf0] %v222_v45  ;;  %120 = vrot.lane.b32.xlu1 %v783_v16, %s721_s25 }
 0x12f   :  { %v236_v13 = vpop.permute.xlu0 %235 }
 0x130   :  { %v260_v46 = vpop.permute.xlu1 %259  ;;  %v240_v47 = vsel %vm239_vm13, %v234_v28, %v236_v13  ;;  %v241_v48 = vsel %vm239_vm13, %v236_v13, %v238_v43 }
 0x131   :  { %v244_v49 = vsel %vm773_vm6, %v240_v47, 0.0  ;;  %v245_v50 = vsel %vm779_vm7, %v241_v48, 0.0 }
 0x132   :  { %246 = vst [vmem:[#allocation3 + $0x58] sm:$0xf] %v244_v49 }
 0x133   :  { %247 = vst [vmem:[#allocation3 + $0x70] sm:$0xf] %v245_v50  ;;  %v480_v4 = vld [vmem:[#allocation3 + $0x60] sm:$0xff] }
 0x134   :  { %v481_v5 = vld [vmem:[#allocation3 + $0x38] sm:$0xff] }
 0x137   :  { %v258_v51 = vpop.permute.xlu0 %257  ;;  %v311_v52 = vpop.permute.xlu2 %310 }
 0x138   :  { %v262_v16 = vsel %vm261_vm14, %v256_v41, %v258_v51  ;;  %v263_v53 = vsel %vm261_vm14, %v258_v51, %v260_v46  ;;  %v279_v54 = vpop.permute.xlu1 %278 }
 0x139   :  { %266 = vst [vmem:[#allocation3 + $0x58] sm:$0xf0] %v262_v16 }
 0x13a   :  { %267 = vst [vmem:[#allocation3 + $0x70] sm:$0xf0] %v263_v53 }
 0x13f   :  { %v277_v55 = vpop.permute.xlu0 %276  ;;  %v329_v56 = vpop.permute.xlu2 %328 }
 0x140   :  { %v281_v57 = vsel %vm280_vm15, %v275_v9, %v277_v55  ;;  %v282_v58 = vsel %vm280_vm15, %v277_v55, %v279_v54  ;;  %v315_v61 = vpop.permute.xlu1 %314  ;;  %v484_v1 = vld [vmem:[#allocation3 + $0x58] sm:$0xff] }
 0x141   :  { %v285_v59 = vsel %vm905_vm11, %v281_v57, 0.0  ;;  %v286_v60 = vsel %vm911_vm12, %v282_v58, 0.0  ;;  %v485_v2 = vld [vmem:[#allocation3 + $0x70] sm:$0xff]  ;;  %v723_v57 = vmov 0  }
 0x142   :  { %287 = vst [vmem:[#allocation3 + $0x8] sm:$0xf] %v285_v59  ;;  %656 = vset.pattern.permute.xlu2 %v723_v57  ;;  %657 = vset.pattern.permute.xlu0 %v723_v57 }
 0x143   :  { %288 = vst [vmem:[#allocation3 + $0x78] sm:$0xf] %v286_v60 }
 0x147   :  { %v349_v62 = vpop.permute.xlu2 %348 }
 0x148   :  { %v333_v3 = vpop.permute.xlu1 %332 }
 0x149   :  { %v488_v63 = vld [vmem:[#allocation3 + $0x8] sm:$0xf] }
 0x14a   :  { %631 = vmatpush.msk.msra.mxu0 %vm502_vm0, %v488_v63  ;;  %v489_v0 = vld [vmem:[#allocation3 + $0x78] sm:$0xf] }
 0x14b   :  { %633 = vmatpush.msk.msra.mxu1 %vm502_vm0, %v489_v0 }
 0x14c   :  { %527 = vmatpush.msra.mxu0 %v484_v1 }
 0x14d   :  { %547 = vmatpush.msra.mxu1 %v485_v2 }
 0x14e   :  { %528 = vmatpush.msra.mxu0 %v480_v4 }
 0x14f   :  { %548 = vmatpush.msra.mxu1 %v481_v5  ;;  %v313_v6 = vpop.permute.xlu0 %312  ;;  %v375_v11 = vpop.permute.xlu2 %374 }
 0x150   :  { %v316_v7 = vsel %vm122_vm1, %v311_v52, %v313_v6  ;;  %v317_v10 = vsel %vm122_vm1, %v313_v6, %v315_v61  ;;  %v353_v17 = vpop.permute.xlu1 %352 }
 0x151   :  { %320 = vst [vmem:[#allocation3 + $0x48] sm:$0xf0] %v316_v7 }
 0x152   :  { %321 = vst [vmem:[#allocation3 + $0x80] sm:$0xf0] %v317_v10 }
 0x157   :  { %v331_v18 = vpop.permute.xlu0 %330  ;;  %v393_v26 = vpop.permute.xlu2 %392 }
 0x158   :  { %v334_v19 = vsel %vm145_vm2, %v329_v56, %v331_v18  ;;  %v335_v20 = vsel %vm145_vm2, %v331_v18, %v333_v3  ;;  %v379_v32 = vpop.permute.xlu1 %378  ;;  %v492_v56 = vld [vmem:[%s1000_s2] sm:$0xff] }
 0x159   :  { %v338_v24 = vsel %vm905_vm11, %v334_v19, 0.0  ;;  %v339_v25 = vsel %vm911_vm12, %v335_v20, 0.0  ;;  %495 = vperm.xlu2 %656, %v492_v56  }
 0x15a   :  { %340 = vst [vmem:[#allocation3 + $0x18] sm:$0xf] %v338_v24 }
 0x15b   :  { %341 = vst [vmem:[#allocation3 + $0x20] sm:$0xf] %v339_v25 }
 0x15f   :  { %v351_v29 = vpop.permute.xlu0 %350 }
 0x160   :  { %v354_v30 = vsel %vm166_vm8, %v349_v62, %v351_v29  ;;  %v355_v31 = vsel %vm166_vm8, %v351_v29, %v353_v17  ;;  %v462_v36 = vpop.permute.xlu2 %461  ;;  %v397_v40 = vpop.permute.xlu1 %396  ;;  %v474_v29 = vld [vmem:[#allocation3 + $0x48] sm:$0xff] }
 0x161   :  { %v358_v33 = vsel %vm773_vm6, %v354_v30, 0.0  ;;  %v359_v34 = vsel %vm779_vm7, %v355_v31, 0.0  ;;  %v475_v30 = vld [vmem:[#allocation3 + $0x80] sm:$0xff] }
 0x162   :  { %v362_v35 = vrot.slane %v358_v33, 4  ;;  %v363_v28 = vrot.slane %v359_v34, 4 }
 0x164   :  { %366 = vst [vmem:[#allocation3 + $0x18] sm:$0xf0] %v362_v35 }
 0x165   :  { %367 = vst [vmem:[#allocation3 + $0x20] sm:$0xf0] %v363_v28 }
 0x167   :  { %v377_v37 = vpop.permute.xlu0 %376 }
 0x168   :  { %v380_v38 = vsel %vm193_vm9, %v375_v11, %v377_v37  ;;  %v381_v39 = vsel %vm193_vm9, %v377_v37, %v379_v32  ;;  %v419_v42 = vpop.permute.xlu2 %418  ;;  %v423_v45 = vpop.permute.xlu1 %422 }
 0x169   :  { %384 = vst [vmem:[#allocation3 + $0x98] sm:$0xf] %v380_v38 }
 0x16a   :  { %385 = vst [vmem:[#allocation3 + $0x30] sm:$0xf] %v381_v39 }
 0x16b   :  { %v478_v20 = vld [vmem:[#allocation3 + $0x18] sm:$0xff] }
 0x16c   :  { %v479_v25 = vld [vmem:[#allocation3 + $0x20] sm:$0xff] }
 0x16f   :  { %v395_v41 = vpop.permute.xlu0 %394 }
 0x170   :  { %v398_v43 = vsel %vm212_vm10, %v393_v26, %v395_v41  ;;  %v399_v23 = vsel %vm212_vm10, %v395_v41, %v397_v40  ;;  %v440_v49 = vpop.permute.xlu2 %439  ;;  %v444_v50 = vpop.permute.xlu1 %443 }
 0x171   :  { %v402_v44 = vsel %vm905_vm11, %v398_v43, 0.0  ;;  %v403_v21 = vsel %vm911_vm12, %v399_v23, 0.0 }
 0x172   :  { %v406_v8 = vrot.slane %v402_v44, 4  ;;  %v407_v12 = vrot.slane %v403_v21, 4 }
 0x174   :  { %410 = vst [vmem:[#allocation3 + $0x98] sm:$0xf0] %v406_v8 }
 0x175   :  { %411 = vst [vmem:[#allocation3 + $0x30] sm:$0xf0] %v407_v12 }
 0x177   :  { %v421_v9 = vpop.permute.xlu0 %420 }
 0x178   :  { %v424_v13 = vsel %vm239_vm13, %v419_v42, %v421_v9  ;;  %v425_v46 = vsel %vm239_vm13, %v421_v9, %v423_v45  ;;  %v140_v53 = vpop.permute.xlu2 %139 }
 0x179   :  { %v428_v47 = vsel %vm773_vm6, %v424_v13, 0.0  ;;  %v429_v48 = vsel %vm779_vm7, %v425_v46, 0.0 }
 0x17a   :  { %430 = vst [vmem:[#allocation3 + $0x40] sm:$0xf] %v428_v47 }
 0x17b   :  { %431 = vst [vmem:[#allocation3 + $0x88] sm:$0xf] %v429_v48  ;;  %v482_v27 = vld [vmem:[#allocation3 + $0x98] sm:$0xff] }
 0x17c   :  { %v483_v18 = vld [vmem:[#allocation3 + $0x30] sm:$0xff] }
 0x17f   :  { %v442_v51 = vpop.permute.xlu0 %441 }
 0x180   :  { %v445_v52 = vsel %vm261_vm14, %v440_v49, %v442_v51  ;;  %v446_v16 = vsel %vm261_vm14, %v442_v51, %v444_v50  ;;  %v117_v58 = vpop.permute.xlu2 %116 }
 0x181   :  { %449 = vst [vmem:[#allocation3 + $0x40] sm:$0xf0] %v445_v52 }
 0x182   :  { %450 = vst [vmem:[#allocation3 + $0x88] sm:$0xf0] %v446_v16 }
 0x187   :  { %v142_v54 = vpop.permute.xlu0 %141  ;;  %v458_v55 = vpop.permute.xlu1 %457 }
 0x188   :  { %v146_v14 = vsel %vm145_vm2, %v140_v53, %v142_v54  ;;  %v486_v11 = vld [vmem:[#allocation3 + $0x40] sm:$0xff] }
 0x189   :  { %v150_v15 = vsel %vm905_vm11, %v146_v14, 0.0  ;;  %v487_v17 = vld [vmem:[#allocation3 + $0x88] sm:$0xff] }
 0x18a   :  { %152 = vst [vmem:[#allocation3 + $0x10] sm:$0xf] %v150_v15 }
 0x18f   :  { %v119_v59 = vpop.permute.xlu0 %118  ;;  %v460_v60 = vpop.permute.xlu1 %459 }
 0x190   :  { %v123_v61 = vsel %vm122_vm1, %v117_v58, %v119_v59  ;;  %v463_v62 = vsel %vm280_vm15, %v458_v55, %v460_v60  ;;  %v464_v63 = vsel %vm280_vm15, %v460_v60, %v462_v36 }
 0x191   :  { %127 = vst [vmem:[#allocation3] sm:$0xf0] %v123_v61  ;;  %v467_v0 = vsel %vm905_vm11, %v463_v62, 0.0  ;;  %v468_v1 = vsel %vm911_vm12, %v464_v63, 0.0  ;;  %v476_v2 = vld [vmem:[#allocation3 + $0x10] sm:$0xff] }
 0x192   :  { %469 = vst [vmem:[#allocation3 + $0x50] sm:$0xf] %v467_v0  ;;  %529 = vmatpush.msra.mxu0 %v476_v2 }
 0x193   :  { %470 = vst [vmem:[#allocation3 + $0x90] sm:$0xf] %v468_v1 }
 0x197   :  { %v144_v3 = vpop.permute.xlu1 %143 }
 0x198   :  { %v147_v4 = vsel %vm145_vm2, %v142_v54, %v144_v3  ;;  %v472_v5 = vld [vmem:[#allocation3] sm:$0xff] }
 0x199   :  { %v151_v6 = vsel %vm911_vm12, %v147_v4, 0.0  ;;  %530 = vmatpush.msra.mxu0 %v472_v5  ;;  %v490_v7 = vld [vmem:[#allocation3 + $0x50] sm:$0xf] }
 0x19a   :  { %153 = vst [vmem:[#allocation3 + $0x28] sm:$0xf] %v151_v6  ;;  %635 = vmatpush.msk.msra.mxu2 %vm502_vm0, %v490_v7  ;;  %v491_v10 = vld [vmem:[#allocation3 + $0x90] sm:$0xf]  ;;  %632 = vmatmul.msk.f32.vlgmr.msra.gmra.mxu0 %vm498_vm3, %v471_v22 }
 0x19b   :  { %637 = vmatpush.msk.msra.mxu3 %vm502_vm0, %v491_v10 }
 0x19c   :  { %567 = vmatpush.msra.mxu2 %v486_v11 }
 0x19d   :  { %587 = vmatpush.msra.mxu3 %v487_v17 }
 0x19e   :  { %568 = vmatpush.msra.mxu2 %v482_v27 }
 0x19f   :  { %588 = vmatpush.msra.mxu3 %v483_v18  ;;  %v121_v19 = vpop.permute.xlu1 %120 }
 0x1a0   :  { %v124_v24 = vsel %vm122_vm1, %v119_v59, %v121_v19  ;;  %569 = vmatpush.msra.mxu2 %v478_v20 }
 0x1a1   :  { %128 = vst [vmem:[#allocation3 + $0x68] sm:$0xf0] %v124_v24  ;;  %589 = vmatpush.msra.mxu3 %v479_v25  ;;  %v477_v26 = vld [vmem:[#allocation3 + $0x28] sm:$0xff] }
 0x1a2   :  { %549 = vmatpush.msra.mxu1 %v477_v26  ;;  %570 = vmatpush.msra.mxu2 %v474_v29 }
 0x1a3   :  { %590 = vmatpush.msra.mxu3 %v475_v30  ;;  %636 = vmatmul.msk.f32.vlgmr.msra.gmra.mxu2 %vm498_vm3, %v471_v22 }
 0x1a4   :  { %638 = vmatmul.msk.f32.vlgmr.msra.gmra.mxu3 %vm498_vm3, %v471_v22 }
 0x1a8   :  { %v473_v31 = vld [vmem:[#allocation3 + $0x68] sm:$0xff] }
 0x1a9   :  { %550 = vmatpush.msra.mxu1 %v473_v31 }
 0x1aa   :  { %634 = vmatmul.msk.f32.vlgmr.msra.gmra.mxu1 %vm498_vm3, %v471_v22 }
 0x1b3   :  { %v496_v32 = vpop.permute.xlu2 %495 }
 0x217   :  { %v532_v33 = vpop.f32.mrf.mxu0 }
 0x218   :  { %v533_v34 = vadd.f32 %v532_v33, %v496_v32 }
 0x21a   :  { %vm595_vm4 = vcmp.ge.f32.partialorder %v533_v34, 0.0  ;;  %v599_v35 = vmul.f32 0.2, %v533_v34 }
 0x21c   :  { %v603_v28 = vsel %vm595_vm4, %v533_v34, %v599_v35 }
 0x21d   :  { %607 = vst [vmem:[#allocation7] sm:$0xff] %v603_v28 }
 0x226   :  { %v572_v36 = vpop.f32.mrf.mxu2 }
 0x227   :  { %v573_v37 = vadd.f32 %v572_v36, %v496_v32  ;;  %v592_v38 = vpop.f32.mrf.mxu3  ;;  %v552_v39 = vpop.f32.mrf.mxu1 }
 0x228   :  { %v593_v40 = vadd.f32 %v592_v38, %v496_v32  ;;  %v553_v41 = vadd.f32 %v552_v39, %v496_v32 }
 0x229   :  { %vm597_vm5 = vcmp.ge.f32.partialorder %v573_v37, 0.0  ;;  %v601_v42 = vmul.f32 0.2, %v573_v37 }
 0x22a   :  { %vm598_vm6 = vcmp.ge.f32.partialorder %v593_v40, 0.0  ;;  %v602_v43 = vmul.f32 0.2, %v593_v40  ;;  %vm596_vm7 = vcmp.ge.f32.partialorder %v553_v41, 0.0  ;;  %v600_v23 = vmul.f32 0.2, %v553_v41 }
 0x22b   :  { %v605_v44 = vsel %vm597_vm5, %v573_v37, %v601_v42 }
 0x22c   :  { %610 = vst [vmem:[#allocation7 + $0x10] sm:$0xff] %v605_v44  ;;  %v606_v21 = vsel %vm598_vm6, %v593_v40, %v602_v43  ;;  %v604_v8 = vsel %vm596_vm7, %v553_v41, %v600_v23 }
 0x22d   :  { %611 = vst [vmem:[#allocation7 + $0x18] sm:$0xff] %v606_v21 }
 0x22e   :  { %608 = vst [vmem:[#allocation7 + $0x8] sm:$0xff] %v604_v8 }
 0x22f   :  { %624 = dma.vmem_to_hbm [thread:$0]  %s617_s30, 512, %s619_s6, [#allocation6], %s725_s7, %s725_s7, %s726_s8  }
 0x230   :  { %708 = dma.done.wait [#allocation6], 512  }
 0x231   :  { %709 = vsyncadd [#allocation6], 4294966784 }
 0x232   :  { %629 = vsyncpa [#allocation5], 1 }
 0x233   :  { %630 = vsyncpa [#allocation6], 1 }

</bundles_post_ra>
